<compile_context>
chip_gen: v7x
topology: tpu7x:2x2x1
jax: 0.10.0
libtpu: 0.0.40
codegen_flags: <defaults>
</compile_context>

<pallas_src>
import jax
import jax.numpy as jnp
from jax.experimental import pallas as pl
from jax.experimental.pallas import tpu as pltpu

HIDDEN = 30


def _round_up(v, m):
    return ((v + m - 1) // m) * m


def ffn_kernel(x_ref, w1_ref, b1_ref, w2_ref, b2_ref, w34_ref, b34_ref, o_ref):
    """Fused MLP forward on one batch tile.

    Layout: activations are (features, TILE_B) so the 128-lane axis is batch.
      x_ref   : (1,  TILE_B)
      w1_ref  : (30, 1)      b1_ref : (30, 1)
      w2_ref  : (30, 30)     b2_ref : (30, 1)
      w34_ref : (2,  30)     b34_ref: (2,  1)
      o_ref   : (2,  TILE_B)
    """
    x = x_ref[...]  # (1, TB) f32

    # Layer 1: in_features == 1 -> VPU broadcast multiply, not a padded K=1 MXU dot.
    # (30,1) * (1,TB) + (30,1) -> (30, TB)
    h = w1_ref[...] * x + b1_ref[...]
    # sigmoid(z) == 0.5 * (tanh(z/2) + 1): one EUP op (tanh) + cheap VPU mul/add,
    # instead of exp + reciprocal on the saturating EUP slot.
    h = 0.5 * (jnp.tanh(0.5 * h) + 1.0)

    # Layer 2: (30,30) @ (30,TB) on the MXU, f32 accumulation, default precision.
    h = jnp.dot(w2_ref[...], h, preferred_element_type=jnp.float32) + b2_ref[...]
    h = 0.5 * (jnp.tanh(0.5 * h) + 1.0)

    # Fused layers 3+4: (2,30) @ (30,TB).
    out = jnp.dot(w34_ref[...], h, preferred_element_type=jnp.float32) + b34_ref[...]

    o_ref[...] = out.astype(o_ref.dtype)


def ffn_forward(x, params, *, tile_b=8192, batch_major_output=True):
    """x: (B, 1) float32 -> (B, 2) float32 (or (2, B) if batch_major_output=False)."""
    w1, b1, w2, b2, w3, b3, w4, b4 = params
    B = x.shape[0]

    # Fold the last two linears (exact up to f32 rounding): one matmul fewer.
    w34 = w4 @ w3              # (2,10) @ (10,30) -> (2,30)
    b34 = w4 @ b3 + b4         # (2,10) @ (10,1) + (2,1) -> (2,1)

    # --- Batch-tile selection -------------------------------------------------
    # * multiple of 128 (lane width), capped at 32768 (working set ~120 B/lane,
    #   comfortably inside v7x's 32 MiB scoped VMEM).
    # * never larger than the (padded) batch.
    # * when B >= 256, force at least 2 roughly-balanced grid steps so the
    #   "parallel" batch axis can be sharded across both v7x TensorCores.
    b128 = _round_up(B, 128)
    tile_b = _round_up(max(128, min(int(tile_b), 32768)), 128)
    tile_b = min(tile_b, b128)
    if B >= 256:
        tile_b = min(tile_b, _round_up(b128 // 2, 128))
    b_pad = _round_up(B, tile_b)

    # Batch-on-lanes layout: (1, B) input, (2, B) output; pad batch to the grid.
    xt = jnp.transpose(x)                                  # (1, B) — layout-free
    if b_pad != B:
        xt = jnp.pad(xt, ((0, 0), (0, b_pad - B)))

    grid = (b_pad // tile_b,)

    def _resident(a):
        # Full-array block, same block every grid step -> stays in VMEM.
        return pl.BlockSpec(a.shape, lambda i: (0, 0))

    n_weight_elems = sum(int(a.size) for a in (w1, b1, w2, b2, w34, b34))
    cost = pl.CostEstimate(
        flops=2 * b_pad * (HIDDEN + HIDDEN * HIDDEN + 2 * HIDDEN),
        transcendentals=b_pad * 2 * HIDDEN,                # 2 sigmoids -> tanh
        bytes_accessed=4 * b_pad * (1 + 2) + 4 * n_weight_elems,
    )

    out_t = pl.pallas_call(
        ffn_kernel,
        out_shape=jax.ShapeDtypeStruct((2, b_pad), jnp.float32),
        grid=grid,
        in_specs=[
            pl.BlockSpec((1, tile_b), lambda i: (0, i)),   # x tile (pipelined, 2-deep)
            _resident(w1), _resident(b1),
            _resident(w2), _resident(b2),
            _resident(w34), _resident(b34),
        ],
        out_specs=pl.BlockSpec((2, tile_b), lambda i: (0, i)),
        compiler_params=pltpu.CompilerParams(
            dimension_semantics=("parallel",),             # megacore on v7x
            vmem_limit_bytes=32 * 1024 * 1024,
        ),
        cost_estimate=cost,
    )(xt, w1, b1, w2, b2, w34, b34)

    out_cb = out_t[:, :B]                                  # (2, B), channel-major
    if not batch_major_output:
        return out_cb                                      # skip the HBM transpose
    return jnp.transpose(out_cb)                           # (B, 2) — module semantics


def init_params(key):
    """PyTorch-style Linear init: U(-1/sqrt(fan_in), 1/sqrt(fan_in)).
    Weights are (out, in); biases are (out, 1)."""
    dims = [(1, HIDDEN), (HIDDEN, HIDDEN), (HIDDEN, 10), (10, 2)]
    params = []
    for fan_in, fan_out in dims:
        key, kw, kb = jax.random.split(key, 3)
        bound = 1.0 / (fan_in ** 0.5)
        w = jax.random.uniform(kw, (fan_out, fan_in), jnp.float32, -bound, bound)
        b = jax.random.uniform(kb, (fan_out, 1), jnp.float32, -bound, bound)
        params.extend([w, b])
    return tuple(params)


def ffn_reference(x, params):
    """Pure-JAX reference (unfused, layer by layer)."""
    w1, b1, w2, b2, w3, b3, w4, b4 = params
    h = jax.nn.sigmoid(x @ w1.T + b1.T)
    h = jax.nn.sigmoid(h @ w2.T + b2.T)
    h = h @ w3.T + b3.T
    return h @ w4.T + b4.T


if __name__ == "__main__":
    key = jax.random.PRNGKey(0)
    key, kx1, kx2, kx3 = jax.random.split(key, 4)
    params = init_params(key)

    # Small batch (pads to one 128-wide tile, single grid step).
    batch = 8
    x_small = jax.random.normal(kx1, (batch, 1), jnp.float32)
    out_small = jax.block_until_ready(ffn_forward(x_small, params))
    ref_small = ffn_reference(x_small, params)
    assert out_small.shape == (batch, 2)
    assert jnp.allclose(out_small, ref_small, atol=2e-5, rtol=2e-5), "mismatch (B=8)"

    # Batch not a multiple of the tile: exercises the >=2-step grid + tail pad.
    batch2 = 300
    x_mid = jax.random.normal(kx2, (batch2, 1), jnp.float32)
    out_mid = jax.block_until_ready(ffn_forward(x_mid, params))
    ref_mid = ffn_reference(x_mid, params)
    assert out_mid.shape == (batch2, 2)
    assert jnp.allclose(out_mid, ref_mid, atol=2e-5, rtol=2e-5), "mismatch (B=300)"

    # Larger batch: two balanced 1024-wide tiles (megacore-friendly), plus the
    # channel-major output path that skips the wrapper transpose.
    batch3 = 2048
    x_big = jax.random.normal(kx3, (batch3, 1), jnp.float32)
    out_big = jax.block_until_ready(ffn_forward(x_big, params))
    out_cb = jax.block_until_ready(ffn_forward(x_big, params, batch_major_output=False))
    ref_big = ffn_reference(x_big, params)
    assert out_big.shape == (batch3, 2)
    assert out_cb.shape == (2, batch3)
    assert jnp.allclose(out_big, ref_big, atol=2e-5, rtol=2e-5), "mismatch (B=2048)"
    assert jnp.allclose(jnp.transpose(out_cb), ref_big, atol=2e-5, rtol=2e-5), \
        "mismatch (B=2048, channel-major)"

    print("KERNEL_OK")
</pallas_src>

<mosaic_0001>
module attributes {stable_mosaic.version = 11 : i64} {
  func.func @ffn_kernel(%arg0: i32, %arg1: memref<1x128xf32, #tpu.memory_space<vmem>>, %arg2: memref<30x1xf32, #tpu.memory_space<vmem>>, %arg3: memref<30x1xf32, #tpu.memory_space<vmem>>, %arg4: memref<30x30xf32, #tpu.memory_space<vmem>>, %arg5: memref<30x1xf32, #tpu.memory_space<vmem>>, %arg6: memref<2x30xf32, #tpu.memory_space<vmem>>, %arg7: memref<2x1xf32, #tpu.memory_space<vmem>>, %arg8: memref<2x128xf32, #tpu.memory_space<vmem>>) attributes {dimension_semantics = [#tpu.dimension_semantics<parallel>], iteration_bounds = array<i64: 1>, scalar_prefetch = 0 : i64, scratch_operands = 0 : i64, tpu.core_type = #tpu.core_type<tc>, window_params = [{transform_indices = @transform_0, window_bounds = array<i64: 1, 128>}, {pipeline_mode = #tpu.pipeline_mode<synchronous>, transform_indices = @transform_1, window_bounds = array<i64: 30, 1>}, {pipeline_mode = #tpu.pipeline_mode<synchronous>, transform_indices = @transform_2, window_bounds = array<i64: 30, 1>}, {pipeline_mode = #tpu.pipeline_mode<synchronous>, transform_indices = @transform_3, window_bounds = array<i64: 30, 30>}, {pipeline_mode = #tpu.pipeline_mode<synchronous>, transform_indices = @transform_4, window_bounds = array<i64: 30, 1>}, {pipeline_mode = #tpu.pipeline_mode<synchronous>, transform_indices = @transform_5, window_bounds = array<i64: 2, 30>}, {pipeline_mode = #tpu.pipeline_mode<synchronous>, transform_indices = @transform_6, window_bounds = array<i64: 2, 1>}, {transform_indices = @transform_7, window_bounds = array<i64: 2, 128>}]} {
    %c0 = arith.constant 0 : index
    %c0_0 = arith.constant 0 : index
    %0 = vector.load %arg1[%c0, %c0_0] : memref<1x128xf32, #tpu.memory_space<vmem>>, vector<1x128xf32>
    %c0_1 = arith.constant 0 : index
    %c0_2 = arith.constant 0 : index
    %1 = vector.load %arg2[%c0_1, %c0_2] : memref<30x1xf32, #tpu.memory_space<vmem>>, vector<30x1xf32>
    %2 = vector.broadcast %1 : vector<30x1xf32> to vector<30x128xf32>
    %3 = vector.broadcast %0 : vector<1x128xf32> to vector<30x128xf32>
    %4 = arith.mulf %2, %3 : vector<30x128xf32>
    %c0_3 = arith.constant 0 : index
    %c0_4 = arith.constant 0 : index
    %5 = vector.load %arg3[%c0_3, %c0_4] : memref<30x1xf32, #tpu.memory_space<vmem>>, vector<30x1xf32>
    %6 = vector.broadcast %5 : vector<30x1xf32> to vector<30x128xf32>
    %7 = arith.addf %4, %6 : vector<30x128xf32>
    %cst = arith.constant 5.000000e-01 : f32
    %8 = vector.broadcast %cst : f32 to vector<30x128xf32>
    %9 = arith.mulf %8, %7 : vector<30x128xf32>
    %10 = math.tanh %9 : vector<30x128xf32>
    %cst_5 = arith.constant 1.000000e+00 : f32
    %11 = vector.broadcast %cst_5 : f32 to vector<30x128xf32>
    %12 = arith.addf %10, %11 : vector<30x128xf32>
    %cst_6 = arith.constant 5.000000e-01 : f32
    %13 = vector.broadcast %cst_6 : f32 to vector<30x128xf32>
    %14 = arith.mulf %13, %12 : vector<30x128xf32>
    %c0_7 = arith.constant 0 : index
    %c0_8 = arith.constant 0 : index
    %15 = vector.load %arg4[%c0_7, %c0_8] : memref<30x30xf32, #tpu.memory_space<vmem>>, vector<30x30xf32>
    %cst_9 = arith.constant dense<0.000000e+00> : vector<30x128xf32>
    %16 = tpu.matmul %15, %14, %cst_9 {dimension_numbers = #tpu.dot_dimension_numbers<[1], [0], [0], [1], [0, 0, 1, 1], [], []>} : vector<30x30xf32>, vector<30x128xf32>, vector<30x128xf32> -> vector<30x128xf32>
    %c0_10 = arith.constant 0 : index
    %c0_11 = arith.constant 0 : index
    %17 = vector.load %arg5[%c0_10, %c0_11] : memref<30x1xf32, #tpu.memory_space<vmem>>, vector<30x1xf32>
    %18 = vector.broadcast %17 : vector<30x1xf32> to vector<30x128xf32>
    %19 = arith.addf %16, %18 : vector<30x128xf32>
    %cst_12 = arith.constant 5.000000e-01 : f32
    %20 = vector.broadcast %cst_12 : f32 to vector<30x128xf32>
    %21 = arith.mulf %20, %19 : vector<30x128xf32>
    %22 = math.tanh %21 : vector<30x128xf32>
    %cst_13 = arith.constant 1.000000e+00 : f32
    %23 = vector.broadcast %cst_13 : f32 to vector<30x128xf32>
    %24 = arith.addf %22, %23 : vector<30x128xf32>
    %cst_14 = arith.constant 5.000000e-01 : f32
    %25 = vector.broadcast %cst_14 : f32 to vector<30x128xf32>
    %26 = arith.mulf %25, %24 : vector<30x128xf32>
    %c0_15 = arith.constant 0 : index
    %c0_16 = arith.constant 0 : index
    %27 = vector.load %arg6[%c0_15, %c0_16] : memref<2x30xf32, #tpu.memory_space<vmem>>, vector<2x30xf32>
    %cst_17 = arith.constant dense<0.000000e+00> : vector<2x128xf32>
    %28 = tpu.matmul %27, %26, %cst_17 {dimension_numbers = #tpu.dot_dimension_numbers<[1], [0], [0], [1], [0, 0, 1, 1], [], []>} : vector<2x30xf32>, vector<30x128xf32>, vector<2x128xf32> -> vector<2x128xf32>
    %c0_18 = arith.constant 0 : index
    %c0_19 = arith.constant 0 : index
    %29 = vector.load %arg7[%c0_18, %c0_19] : memref<2x1xf32, #tpu.memory_space<vmem>>, vector<2x1xf32>
    %30 = vector.broadcast %29 : vector<2x1xf32> to vector<2x128xf32>
    %31 = arith.addf %28, %30 : vector<2x128xf32>
    %c0_20 = arith.constant 0 : index
    %c0_21 = arith.constant 0 : index
    %32 = vector.load %arg8[%c0_20, %c0_21] : memref<2x128xf32, #tpu.memory_space<vmem>>, vector<2x128xf32>
    tpu.vector_store %arg8[%c0_20, %c0_21], %31 {strides = array<i32>} : memref<2x128xf32, #tpu.memory_space<vmem>>, vector<2x128xf32>,
    return
  }
  func.func @transform_0(%arg0: i32) -> (i32, i32) {
    %c0_i32 = arith.constant 0 : i32
    %c0_i32_0 = arith.constant 0 : i32
    return %c0_i32, %arg0 : i32, i32
  }
  func.func @transform_1(%arg0: i32) -> (i32, i32) {
    %c0_i32 = arith.constant 0 : i32
    %c0_i32_0 = arith.constant 0 : i32
    %c0_i32_1 = arith.constant 0 : i32
    return %c0_i32, %c0_i32_0 : i32, i32
  }
  func.func @transform_2(%arg0: i32) -> (i32, i32) {
    %c0_i32 = arith.constant 0 : i32
    %c0_i32_0 = arith.constant 0 : i32
    %c0_i32_1 = arith.constant 0 : i32
    return %c0_i32, %c0_i32_0 : i32, i32
  }
  func.func @transform_3(%arg0: i32) -> (i32, i32) {
    %c0_i32 = arith.constant 0 : i32
    %c0_i32_0 = arith.constant 0 : i32
    %c0_i32_1 = arith.constant 0 : i32
    return %c0_i32, %c0_i32_0 : i32, i32
  }
  func.func @transform_4(%arg0: i32) -> (i32, i32) {
    %c0_i32 = arith.constant 0 : i32
    %c0_i32_0 = arith.constant 0 : i32
    %c0_i32_1 = arith.constant 0 : i32
    return %c0_i32, %c0_i32_0 : i32, i32
  }
  func.func @transform_5(%arg0: i32) -> (i32, i32) {
    %c0_i32 = arith.constant 0 : i32
    %c0_i32_0 = arith.constant 0 : i32
    %c0_i32_1 = arith.constant 0 : i32
    return %c0_i32, %c0_i32_0 : i32, i32
  }
  func.func @transform_6(%arg0: i32) -> (i32, i32) {
    %c0_i32 = arith.constant 0 : i32
    %c0_i32_0 = arith.constant 0 : i32
    %c0_i32_1 = arith.constant 0 : i32
    return %c0_i32, %c0_i32_0 : i32, i32
  }
  func.func @transform_7(%arg0: i32) -> (i32, i32) {
    %c0_i32 = arith.constant 0 : i32
    %c0_i32_0 = arith.constant 0 : i32
    return %c0_i32, %arg0 : i32, i32
  }
}

</mosaic_0001>

<bundles_post_ra>
// kernel: tpu_custom_call.1
= control target key start
LH: loop header
LB: loop body
LE: loop exit
PB: predicated region body
PF: predicated region fallthrough
CT: control target
= control target key end

     0   :  { %v461_v2 = vmov 0   ;;  %s591_s0 = inlined_call_operand.vmem [shape: f32[1,128], index: 0, kind: input, shape index: {}]   ;;  %s592_s1 = inlined_call_operand.vmem [shape: f32[30,1], index: 1, kind: input, shape index: {}]   ;;  %s593_s2 = inlined_call_operand.vmem [shape: f32[30,1], index: 2, kind: input, shape index: {}]   ;;  %s594_s3 = inlined_call_operand.vmem [shape: f32[30,30], index: 3, kind: input, shape index: {}]   ;;  %s595_s4 = inlined_call_operand.vmem [shape: f32[30,1], index: 4, kind: input, shape index: {}]   ;;  %s596_s5 = inlined_call_operand.vmem [shape: f32[2,30], index: 5, kind: input, shape index: {}]   ;;  %s597_s6 = inlined_call_operand.vmem [shape: f32[2,1], index: 6, kind: input, shape index: {}]   ;;  %s598_s7 = inlined_call_operand.hbm [shape: f32[2,128], index: 7, kind: output, shape index: {}]  }
   0x1   :  { %v62_v0 = vld [vmem:[%s593_s2] sm:$0xff]  ;;  %420 = vset.pattern.permute.xlu1 %v461_v2  ;;  %419 = vset.pattern.permute.xlu0 %v461_v2  ;;  %v63_v3 = vld [vmem:[%s593_s2 + $0x8] sm:$0xff] }
   0x2   :  { %v28_v1 = vld [vmem:[%s592_s1] sm:$0xff]  ;;  %68 = vperm.xlu1 %420, %v62_v0   ;;  %v29_v4 = vld [vmem:[%s592_s1 + $0x8] sm:$0xff] }
   0x3   :  { %34 = vperm.xlu0 %419, %v28_v1  }
   0x4   :  { %12 = vsyncpa [#allocation3], 0  ;;  %v31_v5 = vld [vmem:[%s592_s1 + $0x18] sm:$0x3f]  ;;  %v30_v6 = vld [vmem:[%s592_s1 + $0x10] sm:$0xff]  ;;  %vm134_vm0 = vcmask 244736  }
   0x5   :  { %v65_v7 = vld [vmem:[%s593_s2 + $0x18] sm:$0x3f]  ;;  %v64_v8 = vld [vmem:[%s593_s2 + $0x10] sm:$0xff]  ;;  %v111_v9 = vld [vmem:[%s595_s4 + $0x8] sm:$0xff]  ;;  %vm147_vm1 = vcmask 1045504   ;;  %vm462_vm2 = vmmov 1  }
   0x6   :  { %73 = vperm.xlu1 %420, %v63_v3   ;;  %v110_v10 = vld [vmem:[%s595_s4] sm:$0xff]  ;;  %v113_v11 = vld [vmem:[%s595_s4 + $0x18] sm:$0x3f]  ;;  %v112_v12 = vld [vmem:[%s595_s4 + $0x10] sm:$0xff]  ;;  %v463_v54 = vmov 0.0|0.0   ;;  %vm464_vm4 = vmmov 0  }
   0x7   :  { %39 = vperm.xlu0 %419, %v29_v4   ;;  %v253_v13 = vld [vmem:[%s597_s6] sm:$0x3]  ;;  %vm553_vm3 = vmpackc.low %vm147_vm1, %vm462_vm2  ;;  %v107_v51 = vld [vmem:[%s594_s3 + $0x8] sm:$0xff]  ;;  %406 = vmatprep.subr.bf16.mxu1 %v463_v54  ;;  %v465_v55 = vmov 0.0   ;;  %s466_s10 = smov [#allocation2]  }
   0x8   :  { %v106_v14 = vld [vmem:[%s594_s3] sm:$0xff]  ;;  %v108_v52 = vld [vmem:[%s594_s3 + $0x10] sm:$0xff]  ;;  %v109_v53 = vld [vmem:[%s594_s3 + $0x18] sm:$0x3f]  ;;  %393 = vmatprep.mubr.msk.f32.mxu1 %vm464_vm4, %v465_v55  ;;  %s342_s11 = sshll.u32 %s466_s10, 4  ;;  %s343_s11 = int_to_ptr.vmem [resolvable:$true] %s342_s11 }
   0x9   :  { %379 = vmatprep.mubr.msk.f32.mxu0 %vm134_vm0, %v106_v14  ;;  %v350_v15 = vld [vmem:[%s591_s0] ss:$0 sm:$0xff]  ;;  %s437_s12 = scalar_lea.vmem %s343_s11, 32  ;;  %p442_p1 = scmp.lt.s32.totalorder %s343_s11, %s343_s11 }
   0xa   :  { %49 = vperm.xlu1 %420, %v31_v5   ;;  %p438_p0 = scmp.ne.s32.totalorder %s343_s11, %s437_s12  ;;  %p443_p2 = scmp.lt.s32.totalorder %s437_s12, %s437_s12 }
   0xb   :  { %44 = vperm.xlu0 %419, %v30_v6  }
   0xc   :  { %p444_p3 = por %p443_p2, %p442_p1 }
   0xe   :  { %83 = vperm.xlu1 %420, %v65_v7   ;;  %p445_p4 = pnand %p444_p3, %p438_p0 }
   0xf   :  { %78 = vperm.xlu0 %419, %v64_v8  }
  0x12   :  { %121 = vperm.xlu1 %420, %v111_v9  }
  0x13   :  { %116 = vperm.xlu0 %419, %v110_v10  }
  0x16   :  { %131 = vperm.xlu1 %420, %v113_v11  }
  0x17   :  { %126 = vperm.xlu0 %419, %v112_v12  }
  0x1b   :  { %256 = vperm.xlu0 %419, %v253_v13  }
  0x81   :  { %v69_v16 = vpop.permute.xlu1 %68 }
  0x82   :  { %v35_v17 = vpop.permute.xlu0 %34 }
  0x83   :  { %v58_v18 = vmul.f32 %v350_v15, %v35_v17 }
  0x85   :  { %v86_v19 = vadd.f32 %v69_v16, %v58_v18  ;;  %v74_v20 = vpop.permute.xlu1 %73 }
  0x86   :  { %v40_v21 = vpop.permute.xlu0 %39 }
  0x87   :  { %v90_v22 = vmul.f32 0.5, %v86_v19  ;;  %v59_v23 = vmul.f32 %v350_v15, %v40_v21 }
  0x89   :  { %421 = vtanh.f32 %v90_v22  ;;  %v87_v24 = vadd.f32 %v74_v20, %v59_v23  ;;  %v50_v25 = vpop.permute.xlu1 %49  ;;  %v252_v22 = vld [vmem:[%s596_s5] sm:$0x3] }
  0x8a   :  { %v45_v26 = vpop.permute.xlu0 %44  ;;  %v61_v28 = vmul.f32 %v350_v15, %v50_v25 }
  0x8b   :  { %v91_v27 = vmul.f32 0.5, %v87_v24  ;;  %v60_v29 = vmul.f32 %v350_v15, %v45_v26 }
  0x8d   :  { %423 = vtanh.f32 %v91_v27  ;;  %v84_v30 = vpop.permute.xlu1 %83 }
  0x8e   :  { %v79_v31 = vpop.permute.xlu0 %78  ;;  %v89_v32 = vadd.f32 %v84_v30, %v61_v28 }
  0x8f   :  { %v88_v33 = vadd.f32 %v79_v31, %v60_v29 }
  0x90   :  { %v93_v34 = vmul.f32 0.5, %v89_v32 }
  0x91   :  { %v92_v35 = vmul.f32 0.5, %v88_v33  ;;  %v122_v56 = vpop.permute.xlu1 %121 }
  0x92   :  { %425 = vtanh.f32 %v93_v34  ;;  %v117_v57 = vpop.permute.xlu0 %116 }
  0x93   :  { %v422_v36 = vpop.eup %421  ;;  %427 = vtanh.f32 %v92_v35 }
  0x94   :  { %v98_v37 = vadd.f32 1.0, %v422_v36 }
  0x95   :  { %v132_v63 = vpop.permute.xlu1 %131 }
  0x96   :  { %v102_v40 = vmul.f32 0.5, %v98_v37  ;;  %v127_v2 = vpop.permute.xlu0 %126 }
  0x97   :  { %v424_v38 = vpop.eup %423 }
  0x98   :  { %v99_v39 = vadd.f32 1.0, %v424_v38 }
  0x9a   :  { %v103_v41 = vmul.f32 0.5, %v99_v39  ;;  %v257_v23 = vpop.permute.xlu0 %256 }
  0x9c   :  { %v396_v42 = vpack.c.bf16 %v103_v41, %v102_v40  ;;  %v426_v43 = vpop.eup %425 }
  0x9d   :  { %v428_v44 = vpop.eup %427  ;;  %v101_v45 = vadd.f32 1.0, %v426_v43 }
  0x9e   :  { %397 = vmatprep.subr.bf16.mxu0 %v396_v42  ;;  %v100_v46 = vadd.f32 1.0, %v428_v44 }
  0x9f   :  { %399 = vmatpush3.bf16.msra.mxu0 %v396_v42  ;;  %v105_v47 = vmul.f32 0.5, %v101_v45 }
  0xa0   :  { %v104_v48 = vmul.f32 0.5, %v100_v46 }
  0xa2   :  { %v400_v50 = vpack.c.bf16 %v105_v47, %v104_v48 }
  0xa4   :  { %402 = vmatprep.subr.msk.bf16.mxu0 %vm553_vm3, %v400_v50 }
  0xa5   :  { %405 = vmatpush3.bf16.msk.msra.mxu0 %vm553_vm3, %v400_v50 }
  0xa8   :  { %380 = vmatmul.mubr.msk.f32.vlgmr.msra.gmra.mrb[0].mxu0 %vm134_vm0, %v107_v51 }
  0xa9   :  { %382 = vmatprep.mubr.msk.f32.mxu0 %vm134_vm0, %v108_v52 }
  0xac   :  { %383 = vmatmul.mubr.msk.f32.gmra.mrb[2].mxu0 %vm134_vm0, %v109_v53 }
 0x17b   :  { %v381_v58 = vpop.f32.mrb[0].mxu0 }
 0x17c   :  { %v223_v59 = vadd.f32 %v381_v58, %v122_v56  ;;  %v217_v60 = vpop.f32.mrb[1].mxu0 }
 0x17d   :  { %v218_v61 = vadd.f32 %v217_v60, %v117_v57 }
 0x17e   :  { %v237_v62 = vmul.f32 0.5, %v223_v59 }
 0x17f   :  { %v236_v0 = vmul.f32 0.5, %v218_v61  ;;  %v384_v1 = vpop.f32.mrb[2].mxu0 }
 0x180   :  { %429 = vtanh.f32 %v237_v62  ;;  %v233_v3 = vadd.f32 %v384_v1, %v132_v63  ;;  %v227_v4 = vpop.f32.mrb[3].mxu0 }
 0x181   :  { %431 = vtanh.f32 %v236_v0  ;;  %v228_v5 = vadd.f32 %v227_v4, %v127_v2 }
 0x182   :  { %v239_v6 = vmul.f32 0.5, %v233_v3 }
 0x183   :  { %v238_v7 = vmul.f32 0.5, %v228_v5 }
 0x184   :  { %433 = vtanh.f32 %v239_v6 }
 0x185   :  { %435 = vtanh.f32 %v238_v7 }
 0x18a   :  { %v430_v8 = vpop.eup %429 }
 0x18b   :  { %v432_v9 = vpop.eup %431  ;;  %v245_v10 = vadd.f32 1.0, %v430_v8 }
 0x18c   :  { %v244_v11 = vadd.f32 1.0, %v432_v9 }
 0x18d   :  { %v249_v12 = vmul.f32 0.5, %v245_v10 }
 0x18e   :  { %v434_v13 = vpop.eup %433  ;;  %v248_v14 = vmul.f32 0.5, %v244_v11 }
 0x18f   :  { %v436_v15 = vpop.eup %435  ;;  %v247_v16 = vadd.f32 1.0, %v434_v13 }
 0x190   :  { %v246_v17 = vadd.f32 1.0, %v436_v15  ;;  %v407_v18 = vpack.c.bf16 %v249_v12, %v248_v14 }
 0x191   :  { %v251_v19 = vmul.f32 0.5, %v247_v16 }
 0x192   :  { %v250_v20 = vmul.f32 0.5, %v246_v17  ;;  %408 = vmatpush3.bf16.msra.mxu1 %v407_v18 }
 0x193   :  { %409 = vmatprep.subr.bf16.mxu1 %v463_v54 }
 0x194   :  { %v410_v21 = vpack.c.bf16 %v251_v19, %v250_v20 }
 0x196   :  { %412 = vmatpush3.bf16.msk.msra.mxu1 %vm553_vm3, %v410_v21 }
 0x199   :  { %394 = vmatmul.mubr.msk.f32.vlgmr.msra.gmra.mrb[0].mxu1 %vm134_vm0, %v252_v22 }
 0x26c   :  { %v331_v24 = vpop.f32.mrb[0].mxu1 }
 0x26d   :  { %v332_v25 = vadd.f32 %v331_v24, %v257_v23  ;;  %v395_v26 = vpop.f32.mrb[1].mxu1 }
 0x26f   :  { %335 = vst [vmem:[#allocation2] sm:$0x3] %v332_v25 }
 0x270   :  { %448 = shalt.err (!%p445_p4)
}
 0x271   :  { %s449_s5 = scalar_lea.hbm %s598_s7, 32 }
 0x272   :  { %p450_p5 = scmp.ne.s32.totalorder %s598_s7, %s449_s5  ;;  %p453_p6 = scmp.lt.u32.totalorder %s449_s5, %s598_s7 }
 0x274   :  { %p455_p7 = pnand %p453_p6, %p450_p5 }
 0x276   :  { %458 = shalt.err (!%p455_p7)
}
 0x277   :  { %345 = dma.vmem_to_hbm [thread:$0]  %s343_s11, 32, %s598_s7, [#allocation3]  }
 0x278   :  { %459 = dma.done.wait [#allocation3], 32  }
 0x279   :  { %460 = vsyncadd [#allocation3], 4294967264 }
 0x27a   :  { %349 = vsyncpa [#allocation3], 1 }

</bundles_post_ra>
